<compile_context>
chip_gen: v6e
topology: v6e:2x2x1
jax: 0.10.0
libtpu: 0.0.40
codegen_flags: <defaults>
</compile_context>

<pallas_src>
import functools

import jax
import jax.numpy as jnp
from jax.experimental import pallas as pl
from jax.experimental.pallas import tpu as pltpu


# ---------------------------------------------------------------------------
# Kernel 1: 4x4 / stride-2 conv (4 shifted MXU matmuls over a factor-2
# space-to-depth input) + per-channel sum / sum-of-squares accumulation.
# ---------------------------------------------------------------------------
def _conv_stats_kernel(xm_ref, xh_ref, w_ref, y_ref, ssum_ref, ssq_ref, *,
                       th, wo):
    # xm_ref:   (1, TH, Wo+1, 4*Cin) bf16  main s2d rows of this spatial tile
    # xh_ref:   (1, 1,  Wo+1, 4*Cin) bf16  halo row (first s2d row below tile)
    # w_ref:    (4, 4*Cin, TCO)      bf16  weight regrouped by 2x2 block offset
    # y_ref:    (1, TH*Wo, TCO)      f32   un-normalized conv output tile
    # ssum_ref: (1, 1, TCO)          f32   per-channel running sum   (resident)
    # ssq_ref:  (1, 1, TCO)          f32   per-channel running sumsq (resident)
    r = pl.program_id(2)

    @pl.when(r == 0)
    def _init():
        ssum_ref[...] = jnp.zeros_like(ssum_ref)
        ssq_ref[...] = jnp.zeros_like(ssq_ref)

    # TH output rows need TH+1 s2d rows (neighbouring output rows overlap by
    # one s2d row for a k=4 / s=2 conv); stitch the halo row onto the tile.
    x = jnp.concatenate([xm_ref[0], xh_ref[0]], axis=0)        # (TH+1, Wo+1, C4)
    c4 = x.shape[-1]
    tco = y_ref.shape[-1]
    p = th * wo

    # dx-shift hoisted out of the 4-tap loop: two shifted copies, after which
    # every tap is a contiguous leading-dim slice + collapse.
    xs = (x[:, :wo, :], x[:, 1:, :])                           # each (TH+1, Wo, C4)

    acc = jnp.zeros((p, tco), jnp.float32)
    for dy in (0, 1):
        for dx in (0, 1):
            lhs = xs[dx][dy:dy + th].reshape(p, c4)
            acc = acc + jnp.dot(lhs, w_ref[2 * dy + dx],
                                preferred_element_type=jnp.float32)

    y_ref[0] = acc.astype(y_ref.dtype)

    # One chunked pass for sum and sum-of-squares: bounded temporaries and a
    # single sweep over the accumulator (no full acc*acc materialization).
    # TODO(synk): one-pass E[y^2]-mean^2 can cancel if |mean| >> std; a fully
    # two-pass (centered) variance would need one extra reduction over y.
    csum = jnp.zeros((1, tco), jnp.float32)
    csq = jnp.zeros((1, tco), jnp.float32)
    chunk = 512
    for base in range(0, p, chunk):
        blk = acc[base:base + min(chunk, p - base)]
        csum = csum + jnp.sum(blk, axis=0, keepdims=True)
        csq = csq + jnp.sum(blk * blk, axis=0, keepdims=True)
    ssum_ref[0] += csum
    ssq_ref[0] += csq


# ---------------------------------------------------------------------------
# Kernel 2: InstanceNorm apply + LeakyReLU(0.2), bf16 lane-dense writeback.
# ---------------------------------------------------------------------------
def _norm_lrelu_kernel(y_ref, mean_ref, istd_ref, o_ref, *, negative_slope):
    z = (y_ref[...].astype(jnp.float32) - mean_ref[...]) * istd_ref[...]
    o_ref[...] = jnp.where(z > 0, z, negative_slope * z).astype(o_ref.dtype)


# ---------------------------------------------------------------------------
# VMEM sizing helpers (generation aware, temporaries included).
# ---------------------------------------------------------------------------
def _vmem_capacity_bytes():
    try:
        return int(pltpu.get_tpu_info().vmem_capacity_bytes)
    except Exception:
        return 64 << 20                     # conservative default (v7x per-TC)


def _conv_vmem_estimate(th, wo, c4, tco, y_itemsize):
    pt = th * wo
    xm = th * (wo + 1) * c4 * 2
    xh = (wo + 1) * c4 * 2
    wblk = 4 * c4 * tco * 2
    yblk = pt * tco * y_itemsize
    stats = 2 * tco * 4
    pipelined = 2 * (xm + xh + wblk + yblk + stats)     # double-buffered blocks
    temps = ((th + 1) * (wo + 1) * c4 * 2               # concat copy
             + 2 * (th + 1) * wo * c4 * 2               # dx-shifted copies
             + pt * tco * 4                             # f32 accumulator
             + 2 * 512 * tco * 4)                       # chunked-stat temps
    return pipelined + temps + (2 << 20)                # + relayout slack


def _norm_vmem_estimate(th, wo, tco, y_itemsize, out_itemsize):
    pt = th * wo
    pipelined = 2 * (pt * tco * (y_itemsize + out_itemsize) + 2 * tco * 4)
    temps = 3 * pt * tco * 4
    return pipelined + temps + (2 << 20)


def _pick_tile_rows(ho, wo, c4, tco, y_itemsize, budget):
    """Largest divisor of Ho whose conv-kernel VMEM footprint fits `budget`
    (rows kept sublane-aligned unless the tile is the full extent)."""
    legal = [th for th in range(1, ho + 1)
             if ho % th == 0 and (th == ho or (th * wo) % 8 == 0)]
    fitting = [th for th in legal
               if _conv_vmem_estimate(th, wo, c4, tco, y_itemsize) <= budget]
    return max(fitting) if fitting else min(legal)


# ---------------------------------------------------------------------------
# Wrapper
# ---------------------------------------------------------------------------
def unet_down(x_nchw, w_oihw, *, eps=1e-5, negative_slope=0.2, normalize=True,
              out_dtype=jnp.bfloat16, conv_store_dtype=jnp.float32,
              channels_last_out=False):
    """UNetDown forward: Conv2d(4,2,1,bias=False) -> InstanceNorm2d -> LeakyReLU.

    x_nchw: (N, Cin, H, W); w_oihw: (Cout, Cin, 4, 4).
    Returns (N, Cout, H//2, W//2) NCHW (or NHWC if channels_last_out=True).
    """
    N, Cin, H, W = x_nchw.shape
    Cout, Cin_w, KH, KW = w_oihw.shape
    assert Cin_w == Cin and (KH, KW) == (4, 4)
    # TODO(synk): odd H/W (valid for k=4,s=2,p=1) would need a ragged last tile.
    assert H % 2 == 0 and W % 2 == 0, "fast path assumes even H, W"
    Ho, Wo = H // 2, W // 2
    P = Ho * Wo
    C4 = 4 * Cin

    # Cout tiling: exactly Cout lanes when Cout <= 128 (no zero-padded columns
    # computed / written / sliced), else 128-wide lane-dense tiles.
    if Cout <= 128:
        TCO = Cout_p = Cout
    else:
        TCO = 128
        Cout_p = ((Cout + 127) // 128) * 128
    J = Cout_p // TCO

    # ---- glue: pad + factor-2 space-to-depth in ONE transpose, cast to bf16 --
    # x_s2d[n, hr, wr, (sh*2+sw)*Cin + ci] = x_pad[n, ci, 2*hr+sh, 2*wr+sw]
    x_pad = jnp.pad(x_nchw.astype(jnp.bfloat16),
                    ((0, 0), (0, 0), (1, 1), (1, 1)))          # (N,Cin,H+2,W+2)
    x_s2d = x_pad.reshape(N, Cin, Ho + 1, 2, Wo + 1, 2)
    x_s2d = jnp.transpose(x_s2d, (0, 2, 4, 3, 5, 1)).reshape(N, Ho + 1, Wo + 1, C4)

    # ---- weight: (Cout,Cin,4,4) -> (4 block offsets, 4*Cin, Cout_p), bf16 ----
    # w4[dy*2+dx, (sh*2+sw)*Cin + ci, co] = w[co, ci, 2*dy+sh, 2*dx+sw]
    w6 = w_oihw.reshape(Cout, Cin, 2, 2, 2, 2)                 # (co,ci,dy,sh,dx,sw)
    w4 = jnp.transpose(w6, (2, 4, 3, 5, 1, 0)).reshape(4, C4, Cout)
    if Cout_p != Cout:
        w4 = jnp.pad(w4, ((0, 0), (0, 0), (0, Cout_p - Cout)))
    w4 = w4.astype(jnp.bfloat16)

    # ---- spatial row tile from a generation-aware VMEM budget ----------------
    y_isz = jnp.dtype(conv_store_dtype).itemsize
    budget = max(_vmem_capacity_bytes() - (16 << 20), 16 << 20)  # headroom
    TH = _pick_tile_rows(Ho, Wo, C4, TCO, y_isz, budget)
    R = Ho // TH
    PT = TH * Wo

    conv_limit = int(min(budget,
                         max(_conv_vmem_estimate(TH, Wo, C4, TCO, y_isz),
                             32 << 20)))

    # Grid (Cout-tile, batch, spatial-tile): the weight index only depends on
    # the OUTERMOST axis, so the weight tile stays VMEM-resident across batch
    # and space (J DMAs total, not N*J); with the spatial axis innermost this
    # never increases input traffic.  The spatial axis is "arbitrary" because
    # the stats outputs accumulate across it.
    y_unnorm, ssum, ssq = pl.pallas_call(
        functools.partial(_conv_stats_kernel, th=TH, wo=Wo),
        out_shape=(jax.ShapeDtypeStruct((N, P, Cout_p), conv_store_dtype),
                   jax.ShapeDtypeStruct((N, 1, Cout_p), jnp.float32),
                   jax.ShapeDtypeStruct((N, 1, Cout_p), jnp.float32)),
        grid_spec=pltpu.PrefetchScalarGridSpec(
            num_scalar_prefetch=0,
            grid=(J, N, R),
            in_specs=[
                pl.BlockSpec((1, TH, Wo + 1, C4), lambda j, n, r: (n, r, 0, 0)),
                # halo: the single s2d row just below this tile (block size 1
                # along that axis => block index == element row index).
                pl.BlockSpec((1, 1, Wo + 1, C4),
                             lambda j, n, r, _th=TH: (n, (r + 1) * _th, 0, 0)),
                pl.BlockSpec((4, C4, TCO), lambda j, n, r: (0, 0, j)),
            ],
            out_specs=(
                pl.BlockSpec((1, PT, TCO), lambda j, n, r: (n, r, j)),
                pl.BlockSpec((1, 1, TCO), lambda j, n, r: (n, 0, j)),
                pl.BlockSpec((1, 1, TCO), lambda j, n, r: (n, 0, j)),
            )),
        compiler_params=pltpu.CompilerParams(
            dimension_semantics=("parallel", "parallel", "arbitrary"),
            vmem_limit_bytes=conv_limit),
    )(x_s2d, x_s2d, w4)

    # ---- finish InstanceNorm2d statistics (tiny (N, Cout) math, plain JAX) ---
    if normalize:
        inv_p = jnp.float32(1.0 / P)
        mean = ssum * inv_p
        var = jnp.maximum(ssq * inv_p - mean * mean, 0.0)
        istd = jax.lax.rsqrt(var + jnp.float32(eps))
    else:
        mean = jnp.zeros_like(ssum)
        istd = jnp.ones_like(ssq)

    norm_limit = int(min(budget,
                         max(_norm_vmem_estimate(TH, Wo, TCO, y_isz,
                                                 jnp.dtype(out_dtype).itemsize),
                             32 << 20)))

    # ---- Kernel 2: normalize + LeakyReLU(0.2), bf16 writeback ----------------
    out_flat = pl.pallas_call(
        functools.partial(_norm_lrelu_kernel, negative_slope=negative_slope),
        out_shape=jax.ShapeDtypeStruct((N, P, Cout_p), out_dtype),
        grid_spec=pltpu.PrefetchScalarGridSpec(
            num_scalar_prefetch=0,
            grid=(J, N, R),
            in_specs=[
                pl.BlockSpec((1, PT, TCO), lambda j, n, r: (n, r, j)),
                pl.BlockSpec((1, 1, TCO), lambda j, n, r: (n, 0, j)),
                pl.BlockSpec((1, 1, TCO), lambda j, n, r: (n, 0, j)),
            ],
            out_specs=pl.BlockSpec((1, PT, TCO), lambda j, n, r: (n, r, j))),
        compiler_params=pltpu.CompilerParams(
            dimension_semantics=("parallel", "parallel", "parallel"),
            vmem_limit_bytes=norm_limit),
    )(y_unnorm, mean, istd)

    # TODO(synk): Dropout is skipped (module default dropout=0.0 adds no layer).
    if Cout_p != Cout:
        out_flat = out_flat[:, :, :Cout]
    out_nhwc = out_flat.reshape(N, Ho, Wo, Cout)
    if channels_last_out:
        return out_nhwc              # channels-last, for chaining UNetDown blocks
    return jnp.transpose(out_nhwc, (0, 3, 1, 2))                # (N,Cout,Ho,Wo)


def _reference(x_nchw, w_oihw, eps=1e-5, negative_slope=0.2):
    """Pure-JAX reference; inputs rounded to bf16 to match the kernel's MXU operands."""
    xq = x_nchw.astype(jnp.bfloat16).astype(jnp.float32)
    wq = w_oihw.astype(jnp.bfloat16).astype(jnp.float32)
    y = jax.lax.conv_general_dilated(
        xq, wq, window_strides=(2, 2), padding=((1, 1), (1, 1)),
        dimension_numbers=("NCHW", "OIHW", "NCHW"))
    mean = jnp.mean(y, axis=(2, 3), keepdims=True)
    var = jnp.mean((y - mean) ** 2, axis=(2, 3), keepdims=True)
    yn = (y - mean) * jax.lax.rsqrt(var + eps)
    return jnp.where(yn > 0, yn, negative_slope * yn)


if __name__ == "__main__":
    key = jax.random.PRNGKey(0)
    k_x, k_w = jax.random.split(key)

    N, Cin, H, W = 2, 4, 16, 16
    Cout = 8

    x = jax.random.normal(k_x, (N, Cin, H, W), dtype=jnp.float32)
    # deterministic "Kaiming-ish" init for the conv weight (bias=False in the module)
    w = jax.random.normal(k_w, (Cout, Cin, 4, 4), dtype=jnp.float32) * 0.1

    out = jax.block_until_ready(unet_down(x, w))
    assert out.shape == (N, Cout, H // 2, W // 2), out.shape

    ref = jax.block_until_ready(_reference(x, w))
    out_f32 = out.astype(jnp.float32)
    max_err = float(jnp.max(jnp.abs(out_f32 - ref)))
    assert jnp.allclose(out_f32, ref, atol=3e-2, rtol=3e-2), (
        f"mismatch vs reference (max abs err {max_err})")

    print("KERNEL_OK")
</pallas_src>

<mosaic_0001>
module attributes {stable_mosaic.version = 11 : i64} {
  func.func @_conv_stats_kernel(%arg0: i32, %arg1: i32, %arg2: i32, %arg3: memref<1x8x9x16xbf16, #tpu.memory_space<vmem>>, %arg4: memref<1x1x9x16xbf16, #tpu.memory_space<vmem>>, %arg5: memref<4x16x8xbf16, #tpu.memory_space<vmem>>, %arg6: memref<1x64x8xf32, #tpu.memory_space<vmem>>, %arg7: memref<1x1x8xf32, #tpu.memory_space<vmem>>, %arg8: memref<1x1x8xf32, #tpu.memory_space<vmem>>) attributes {dimension_semantics = [#tpu.dimension_semantics<parallel>, #tpu.dimension_semantics<parallel>, #tpu.dimension_semantics<arbitrary>], iteration_bounds = array<i64: 1, 2, 1>, scalar_prefetch = 0 : i64, scratch_operands = 0 : i64, tpu.core_type = #tpu.core_type<tc>, window_params = [{transform_indices = @transform_0, window_bounds = array<i64: 1, 8, 9, 16>}, {transform_indices = @transform_1, window_bounds = array<i64: 1, 1, 9, 16>}, {transform_indices = @transform_2, window_bounds = array<i64: 4, 16, 8>}, {transform_indices = @transform_3, window_bounds = array<i64: 1, 64, 8>}, {transform_indices = @transform_4, window_bounds = array<i64: 1, 1, 8>}, {transform_indices = @transform_5, window_bounds = array<i64: 1, 1, 8>}]} {
    %c0_i32 = arith.constant 0 : i32
    %0 = arith.cmpi eq, %arg2, %c0_i32 : i32
    %1 = arith.extui %0 : i1 to i32
    %c0_i32_0 = arith.constant 0 : i32
    %2 = arith.cmpi ne, %1, %c0_i32_0 : i32
    scf.if %2 {
      %cst_40 = arith.constant 0.000000e+00 : f32
      %59 = vector.broadcast %cst_40 : f32 to vector<1x1x8xf32>
      %c0_41 = arith.constant 0 : index
      %c0_42 = arith.constant 0 : index
      %c0_43 = arith.constant 0 : index
      %60 = vector.load %arg7[%c0_41, %c0_42, %c0_43] : memref<1x1x8xf32, #tpu.memory_space<vmem>>, vector<1x1x8xf32>
      tpu.vector_store %arg7[%c0_41, %c0_42, %c0_43], %59 {strides = array<i32>} : memref<1x1x8xf32, #tpu.memory_space<vmem>>, vector<1x1x8xf32>,
      %cst_44 = arith.constant 0.000000e+00 : f32
      %61 = vector.broadcast %cst_44 : f32 to vector<1x1x8xf32>
      %c0_45 = arith.constant 0 : index
      %c0_46 = arith.constant 0 : index
      %c0_47 = arith.constant 0 : index
      %62 = vector.load %arg8[%c0_45, %c0_46, %c0_47] : memref<1x1x8xf32, #tpu.memory_space<vmem>>, vector<1x1x8xf32>
      tpu.vector_store %arg8[%c0_45, %c0_46, %c0_47], %61 {strides = array<i32>} : memref<1x1x8xf32, #tpu.memory_space<vmem>>, vector<1x1x8xf32>,
    } else {
    }
    %c0 = arith.constant 0 : index
    %c0_1 = arith.constant 0 : index
    %c0_2 = arith.constant 0 : index
    %c0_3 = arith.constant 0 : index
    %3 = vector.load %arg3[%c0, %c0_1, %c0_2, %c0_3] : memref<1x8x9x16xbf16, #tpu.memory_space<vmem>>, vector<1x8x9x16xbf16>
    %4 = vector.shape_cast %3 : vector<1x8x9x16xbf16> to vector<8x9x16xbf16>
    %c0_4 = arith.constant 0 : index
    %c0_5 = arith.constant 0 : index
    %c0_6 = arith.constant 0 : index
    %c0_7 = arith.constant 0 : index
    %5 = vector.load %arg4[%c0_4, %c0_5, %c0_6, %c0_7] : memref<1x1x9x16xbf16, #tpu.memory_space<vmem>>, vector<1x1x9x16xbf16>
    %6 = vector.shape_cast %5 : vector<1x1x9x16xbf16> to vector<1x9x16xbf16>
    %7 = tpu.concatenate %4, %6 in 0 : vector<8x9x16xbf16>, vector<1x9x16xbf16> -> vector<9x9x16xbf16>
    %8 = vector.extract_strided_slice %7 {offsets = [0, 0, 0], sizes = [9, 8, 16], strides = [1, 1, 1]} : vector<9x9x16xbf16> to vector<9x8x16xbf16>
    %9 = vector.extract_strided_slice %7 {offsets = [0, 1, 0], sizes = [9, 8, 16], strides = [1, 1, 1]} : vector<9x9x16xbf16> to vector<9x8x16xbf16>
    %cst = arith.constant 0.000000e+00 : f32
    %10 = vector.broadcast %cst : f32 to vector<64x8xf32>
    %11 = vector.extract_strided_slice %8 {offsets = [0, 0, 0], sizes = [8, 8, 16], strides = [1, 1, 1]} : vector<9x8x16xbf16> to vector<8x8x16xbf16>
    %12 = vector.shape_cast %11 : vector<8x8x16xbf16> to vector<64x16xbf16>
    %c0_8 = arith.constant 0 : index
    %c0_9 = arith.constant 0 : index
    %c0_10 = arith.constant 0 : index
    %13 = vector.load %arg5[%c0_8, %c0_9, %c0_10] : memref<4x16x8xbf16, #tpu.memory_space<vmem>>, vector<1x16x8xbf16>
    %14 = vector.shape_cast %13 : vector<1x16x8xbf16> to vector<16x8xbf16>
    %cst_11 = arith.constant dense<0.000000e+00> : vector<64x8xf32>
    %15 = tpu.matmul %12, %14, %cst_11 {dimension_numbers = #tpu.dot_dimension_numbers<[1], [0], [0], [1], [0, 0, 1, 1], [], []>} : vector<64x16xbf16>, vector<16x8xbf16>, vector<64x8xf32> -> vector<64x8xf32>
    %16 = arith.addf %10, %15 : vector<64x8xf32>
    %17 = vector.extract_strided_slice %9 {offsets = [0, 0, 0], sizes = [8, 8, 16], strides = [1, 1, 1]} : vector<9x8x16xbf16> to vector<8x8x16xbf16>
    %18 = vector.shape_cast %17 : vector<8x8x16xbf16> to vector<64x16xbf16>
    %c1 = arith.constant 1 : index
    %c0_12 = arith.constant 0 : index
    %c0_13 = arith.constant 0 : index
    %19 = vector.load %arg5[%c1, %c0_12, %c0_13] : memref<4x16x8xbf16, #tpu.memory_space<vmem>>, vector<1x16x8xbf16>
    %20 = vector.shape_cast %19 : vector<1x16x8xbf16> to vector<16x8xbf16>
    %cst_14 = arith.constant dense<0.000000e+00> : vector<64x8xf32>
    %21 = tpu.matmul %18, %20, %cst_14 {dimension_numbers = #tpu.dot_dimension_numbers<[1], [0], [0], [1], [0, 0, 1, 1], [], []>} : vector<64x16xbf16>, vector<16x8xbf16>, vector<64x8xf32> -> vector<64x8xf32>
    %22 = arith.addf %16, %21 : vector<64x8xf32>
    %23 = vector.extract_strided_slice %8 {offsets = [1, 0, 0], sizes = [8, 8, 16], strides = [1, 1, 1]} : vector<9x8x16xbf16> to vector<8x8x16xbf16>
    %24 = vector.shape_cast %23 : vector<8x8x16xbf16> to vector<64x16xbf16>
    %c2 = arith.constant 2 : index
    %c0_15 = arith.constant 0 : index
    %c0_16 = arith.constant 0 : index
    %25 = vector.load %arg5[%c2, %c0_15, %c0_16] : memref<4x16x8xbf16, #tpu.memory_space<vmem>>, vector<1x16x8xbf16>
    %26 = vector.shape_cast %25 : vector<1x16x8xbf16> to vector<16x8xbf16>
    %cst_17 = arith.constant dense<0.000000e+00> : vector<64x8xf32>
    %27 = tpu.matmul %24, %26, %cst_17 {dimension_numbers = #tpu.dot_dimension_numbers<[1], [0], [0], [1], [0, 0, 1, 1], [], []>} : vector<64x16xbf16>, vector<16x8xbf16>, vector<64x8xf32> -> vector<64x8xf32>
    %28 = arith.addf %22, %27 : vector<64x8xf32>
    %29 = vector.extract_strided_slice %9 {offsets = [1, 0, 0], sizes = [8, 8, 16], strides = [1, 1, 1]} : vector<9x8x16xbf16> to vector<8x8x16xbf16>
    %30 = vector.shape_cast %29 : vector<8x8x16xbf16> to vector<64x16xbf16>
    %c3 = arith.constant 3 : index
    %c0_18 = arith.constant 0 : index
    %c0_19 = arith.constant 0 : index
    %31 = vector.load %arg5[%c3, %c0_18, %c0_19] : memref<4x16x8xbf16, #tpu.memory_space<vmem>>, vector<1x16x8xbf16>
    %32 = vector.shape_cast %31 : vector<1x16x8xbf16> to vector<16x8xbf16>
    %cst_20 = arith.constant dense<0.000000e+00> : vector<64x8xf32>
    %33 = tpu.matmul %30, %32, %cst_20 {dimension_numbers = #tpu.dot_dimension_numbers<[1], [0], [0], [1], [0, 0, 1, 1], [], []>} : vector<64x16xbf16>, vector<16x8xbf16>, vector<64x8xf32> -> vector<64x8xf32>
    %34 = arith.addf %28, %33 : vector<64x8xf32>
    %c0_21 = arith.constant 0 : index
    %c0_22 = arith.constant 0 : index
    %c0_23 = arith.constant 0 : index
    %35 = vector.load %arg6[%c0_21, %c0_22, %c0_23] : memref<1x64x8xf32, #tpu.memory_space<vmem>>, vector<1x64x8xf32>
    %36 = vector.shape_cast %35 : vector<1x64x8xf32> to vector<64x8xf32>
    %37 = vector.shape_cast %34 : vector<64x8xf32> to vector<1x64x8xf32>
    tpu.vector_store %arg6[%c0_21, %c0_22, %c0_23], %37 {strides = array<i32>} : memref<1x64x8xf32, #tpu.memory_space<vmem>>, vector<1x64x8xf32>,
    %cst_24 = arith.constant 0.000000e+00 : f32
    %38 = vector.broadcast %cst_24 : f32 to vector<1x8xf32>
    %cst_25 = arith.constant 0.000000e+00 : f32
    %39 = vector.broadcast %cst_25 : f32 to vector<1x8xf32>
    %cst_26 = arith.constant dense<0.000000e+00> : vector<8xf32>
    %40 = vector.multi_reduction <add>, %34, %cst_26 [0] : vector<64x8xf32> to vector<8xf32>
    %41 = vector.shape_cast %40 : vector<8xf32> to vector<1x8xf32>
    %42 = arith.addf %38, %41 : vector<1x8xf32>
    %43 = arith.mulf %34, %34 : vector<64x8xf32>
    %cst_27 = arith.constant dense<0.000000e+00> : vector<8xf32>
    %44 = vector.multi_reduction <add>, %43, %cst_27 [0] : vector<64x8xf32> to vector<8xf32>
    %45 = vector.shape_cast %44 : vector<8xf32> to vector<1x8xf32>
    %46 = arith.addf %39, %45 : vector<1x8xf32>
    %c0_28 = arith.constant 0 : index
    %c0_29 = arith.constant 0 : index
    %c0_30 = arith.constant 0 : index
    %47 = vector.load %arg7[%c0_28, %c0_29, %c0_30] : memref<1x1x8xf32, #tpu.memory_space<vmem>>, vector<1x1x8xf32>
    %48 = vector.shape_cast %47 : vector<1x1x8xf32> to vector<1x8xf32>
    %49 = arith.addf %48, %42 : vector<1x8xf32>
    %c0_31 = arith.constant 0 : index
    %c0_32 = arith.constant 0 : index
    %c0_33 = arith.constant 0 : index
    %50 = vector.load %arg7[%c0_31, %c0_32, %c0_33] : memref<1x1x8xf32, #tpu.memory_space<vmem>>, vector<1x1x8xf32>
    %51 = vector.shape_cast %50 : vector<1x1x8xf32> to vector<1x8xf32>
    %52 = vector.shape_cast %49 : vector<1x8xf32> to vector<1x1x8xf32>
    tpu.vector_store %arg7[%c0_31, %c0_32, %c0_33], %52 {strides = array<i32>} : memref<1x1x8xf32, #tpu.memory_space<vmem>>, vector<1x1x8xf32>,
    %c0_34 = arith.constant 0 : index
    %c0_35 = arith.constant 0 : index
    %c0_36 = arith.constant 0 : index
    %53 = vector.load %arg8[%c0_34, %c0_35, %c0_36] : memref<1x1x8xf32, #tpu.memory_space<vmem>>, vector<1x1x8xf32>
    %54 = vector.shape_cast %53 : vector<1x1x8xf32> to vector<1x8xf32>
    %55 = arith.addf %54, %46 : vector<1x8xf32>
    %c0_37 = arith.constant 0 : index
    %c0_38 = arith.constant 0 : index
    %c0_39 = arith.constant 0 : index
    %56 = vector.load %arg8[%c0_37, %c0_38, %c0_39] : memref<1x1x8xf32, #tpu.memory_space<vmem>>, vector<1x1x8xf32>
    %57 = vector.shape_cast %56 : vector<1x1x8xf32> to vector<1x8xf32>
    %58 = vector.shape_cast %55 : vector<1x8xf32> to vector<1x1x8xf32>
    tpu.vector_store %arg8[%c0_37, %c0_38, %c0_39], %58 {strides = array<i32>} : memref<1x1x8xf32, #tpu.memory_space<vmem>>, vector<1x1x8xf32>,
    return
  }
  func.func @transform_0(%arg0: i32, %arg1: i32, %arg2: i32) -> (i32, i32, i32, i32) {
    %c0_i32 = arith.constant 0 : i32
    %c0_i32_0 = arith.constant 0 : i32
    %c0_i32_1 = arith.constant 0 : i32
    return %arg1, %arg2, %c0_i32, %c0_i32_0 : i32, i32, i32, i32
  }
  func.func @transform_1(%arg0: i32, %arg1: i32, %arg2: i32) -> (i32, i32, i32, i32) {
    %c1_i32 = arith.constant 1 : i32
    %0 = arith.addi %arg2, %c1_i32 : i32
    %c8_i32 = arith.constant 8 : i32
    %1 = arith.muli %0, %c8_i32 : i32
    %c0_i32 = arith.constant 0 : i32
    %c0_i32_0 = arith.constant 0 : i32
    %c0_i32_1 = arith.constant 0 : i32
    return %arg1, %1, %c0_i32, %c0_i32_0 : i32, i32, i32, i32
  }
  func.func @transform_2(%arg0: i32, %arg1: i32, %arg2: i32) -> (i32, i32, i32) {
    %c0_i32 = arith.constant 0 : i32
    %c0_i32_0 = arith.constant 0 : i32
    %c0_i32_1 = arith.constant 0 : i32
    return %c0_i32, %c0_i32_0, %arg0 : i32, i32, i32
  }
  func.func @transform_3(%arg0: i32, %arg1: i32, %arg2: i32) -> (i32, i32, i32) {
    %c0_i32 = arith.constant 0 : i32
    return %arg1, %arg2, %arg0 : i32, i32, i32
  }
  func.func @transform_4(%arg0: i32, %arg1: i32, %arg2: i32) -> (i32, i32, i32) {
    %c0_i32 = arith.constant 0 : i32
    %c0_i32_0 = arith.constant 0 : i32
    return %arg1, %c0_i32, %arg0 : i32, i32, i32
  }
  func.func @transform_5(%arg0: i32, %arg1: i32, %arg2: i32) -> (i32, i32, i32) {
    %c0_i32 = arith.constant 0 : i32
    %c0_i32_0 = arith.constant 0 : i32
    return %arg1, %c0_i32, %arg0 : i32, i32, i32
  }
}

</mosaic_0001>

<bundles_post_ra>
// kernel: tpu_custom_call.1
= control target key start
LH: loop header
LB: loop body
LE: loop exit
PB: predicated region body
PF: predicated region fallthrough
CT: control target
= control target key end

     0   :  { %11 = vsyncpa [#allocation3], 0  ;;  %s1911_s0 = inlined_call_operand.vmem [shape: bf16[2,9,9,16], index: 0, kind: input, shape index: {}]   ;;  %s1912_s1 = inlined_call_operand.vmem [shape: bf16[2,9,9,16], index: 1, kind: input, shape index: {}]   ;;  %s1913_s2 = inlined_call_operand.vmem [shape: bf16[4,16,8], index: 2, kind: input, shape index: {}]   ;;  %s1914_s3 = inlined_call_operand.vmem [shape: f32[2,64,8], index: 3, kind: output, shape index: {0}]   ;;  %s1915_s4 = inlined_call_operand.hbm [shape: f32[2,1,8], index: 4, kind: output, shape index: {1}]   ;;  %s1916_s5 = inlined_call_operand.hbm [shape: f32[2,1,8], index: 5, kind: output, shape index: {2}]  }
   0x1   :  { %13 = vsyncpa [#allocation3 + $0x1], 0 }
   0x2   :  { %14 = vsyncpa [#allocation5], 0 }
   0x3   :  { %16 = vsyncpa [#allocation5 + $0x1], 0  ;;  %s1589_s18 = smov 0   ;;  %s1591_s19 = smov 0  }
   0x4   :  { %s1593_s20 = smov 0   ;;  %s1595_s21 = smov 0  }
   0x5   :  { %s1597_s22 = smov 0   ;;  %s1599_s23 = smov 0  }
   0x6 LB: > { %s1254_s24 = sadd.s32 4294967295, %s1554_s23   ;;  %s1255_s25 = sadd.s32 4294967294, %s1554_s23   ;;  %s1554_s23 = sphi %s1599_s23, %s22_s23   ;;  %s1550_s22 = sphi %s1597_s22, %s1925_s22   ;;  %s1546_s21 = sphi %s1595_s21, %s1924_s21   ;;  %s1542_s20 = sphi %s1593_s20, %s1923_s20   ;;  %s1538_s19 = sphi %s1591_s19, %s1922_s19   ;;  %s1534_s18 = sphi %s1589_s18, %s1921_s18  }
   0x7   : > { %s37_s26 = sadd.s32 1, %s1550_s22  ;;  %s166_s27 = sadd.s32 1, %s1542_s20 }
   0x8   : > { %p39_p0 = scmp.ge.s32.totalorder %s37_s26, 2  ;;  %p176_p1 = scmp.ne.s32.totalorder %s1542_s20, %s1538_s19 }
   0x9   : > { %p177_p2 = scmp.eq.s32.totalorder %s1254_s24, 1  ;;  %p182_p3 = scmp.ne.s32.totalorder %s1538_s19, %s1534_s18 }
   0xa   : > { %s1927_s26 = smov (%p39_p0, %s37_s26), 0  ;;  %p183_p5 = scmp.eq.s32.totalorder %s1255_s25, 1 }
   0xb   : > { %p1629_p4 = por %p177_p2, %p176_p1  ;;  %s161_s29 = ssub.s32 %s1550_s22, %s1927_s26 }
   0xc   : > { %p1259_p6 = scmp.ge.s32.totalorder %s1554_s23, 1  ;;  %p164_p7 = scmp.eq.s32.totalorder %s161_s29, 0 }
   0xd   : > { %p1636_p8 = por %p183_p5, %p182_p3  ;;  %p276_p9 = scmp.lt.s32.totalorder %s1554_s23, 3 }
   0xe   : > { %s1642_s6 = scalar_select %p164_p7, %s1542_s20, %s166_s27  }
   0xf   : > { %p277_p10 = pnand %p1259_p6, %p276_p9 }
  0x10   : > { %p350_p11 = scmp.lt.s32.totalorder (!%p277_p10), %s1546_s21, 1  ;;  %s1774_s9 = sand.u32 (!%p277_p10), 1, %s1538_s19  }
  0x11   : > { %280 = sbr.rel (%p277_p10) target bundleno = 329 (0x149), region = 32  ;;  %s1777_s10 = scalar_lea.vmem (!%p277_p10), [#allocation2], %s1774_s9 }
  0x12   : > { %s1782_s12 = scalar_lea.vmem (!%p277_p10), [#allocation4], %s1774_s9  ;;  %s1055_s17 = sshll.u32 (!%p277_p10), %s1777_s10, 4  ;;  %s1834_s17 = int_to_ptr.vmem [resolvable:$true] %s1055_s17 }
  0x13   : > { %s1069_s24 = sshll.u32 (!%p277_p10), %s1782_s12, 4  ;;  %s1557_s15 = smov (!%p277_p10), [#allocation2]   ;;  %s1843_s24 = int_to_ptr.vmem [resolvable:$true] %s1069_s24 }
  0x16   : > { %v1437_v0 = vld [vmem:[%s1913_s2] sm:$0xff]   ;;  %v1438_v1 = vld [vmem:[%s1913_s2 + $0x8] sm:$0xff]   ;;  %s1652_s11 = scalar_select %p350_p11, %s1546_s21, 1  ;;  %v1657_v2 = vld [vmem:[%s1913_s2 + $0x10] sm:$0xff]   ;;  %vm559_vm0 = vcmask 130048   ;;  %vm400_vm4 = vcmask 57344  }
  0x17   : > { %1343 = vmatprep.subr.bf16.mxu1 %v1437_v0  ;;  %1333 = vmatprep.subr.bf16.mxu0 %v1438_v1  ;;  %v1442_v3 = vld [vmem:[%s1913_s2 + $0x18] sm:$0xff]   ;;  %vm423_vm1 = vsmask.f32 3328  ;;  %vm424_vm2 = vsmask.f32 7440  ;;  %vm953_vm5 = vcmask 64512  }
  0x18   : > { %1344 = vmatpush3.bf16.msra.mxu1 %v1437_v0  ;;  %s1373_s14 = smul.u32 72, %s1652_s11  ;;  %1334 = vmatpush3.bf16.msra.mxu0 %v1438_v1  ;;  %vm1697_vm3 = vmor %vm423_vm1, %vm424_vm2  ;;  %s1312_s13 = sshll.u32 %s1652_s11, 6 }
  0x19   : > { %1353 = vmatprep.subr.bf16.mxu0 %v1657_v2  ;;  %1363 = vmatprep.subr.bf16.mxu1 %v1442_v3  ;;  %s1790_s16 = scalar_lea.vmem %s1914_s3, %s1312_s13  ;;  %s1306_s11 = sshll.u32 %s1546_s21, 4 }
  0x1a   : > { %s1669_s25 = scalar_lea.vmem %s1911_s0, %s1373_s14  ;;  %s1311_s27 = sadd.s32 64, %s1373_s14 }
  0x1b   : > { %v403_v4 = vld [vmem:[%s1669_s25] sm:$0xf]  ;;  %v1673_v5 = vld [vmem:[%s1669_s25 + $0x8] sm:$0xf]  ;;  %v1676_v6 = vld [vmem:[%s1669_s25 + $0x10] sm:$0xf]  ;;  %s375_s8 = scalar_lea.vmem %s1912_s1, %s1311_s27  ;;  %s1832_s29 = scalar_lea.hbm %s1915_s4, %s1306_s11 }
  0x1c   : > { %v427_v7 = vshrl.u32 %v403_v4, 16  ;;  %v430_v8 = vshll.u32 %v403_v4, 16  ;;  %v441_v9 = vshrl.u32 %v1673_v5, 16  ;;  %v444_v10 = vshll.u32 %v1673_v5, 16  ;;  %v1681_v11 = vld [vmem:[%s1669_s25 + $0x18] sm:$0xf] }
  0x1d   : > { %v1275_v12 = vcombine.low %v403_v4, %v1673_v5  ;;  %v1276_v13 = vcombine.low %v1676_v6, %v1681_v11  ;;  %v404_v14 = vld [vmem:[%s1669_s25 + $0x4] sm:$0x1]  ;;  %v406_v15 = vld [vmem:[%s1669_s25 + $0xc] sm:$0x1]  ;;  %v408_v16 = vld [vmem:[%s1669_s25 + $0x14] sm:$0x1] }
  0x1e   : > { %v429_v17 = vrot.slane %v427_v7, 4  ;;  %v432_v18 = vrot.slane %v430_v8, 5  ;;  %v436_v19 = vshll.u32 %v404_v14, 16  ;;  %v443_v20 = vrot.slane %v441_v9, 4  ;;  %v410_v23 = vld [vmem:[%s1669_s25 + $0x1c] sm:$0x1] }
  0x1f   : > { %1345 = vmatprep.mubr.msk.bf16.mxu1 %vm559_vm0, %v1275_v12  ;;  %v446_v21 = vrot.slane %v444_v10, 5  ;;  %v450_v22 = vshll.u32 %v406_v15, 16  ;;  %v455_v25 = vshrl.u32 %v1676_v6, 16  ;;  %v458_v26 = vshll.u32 %v1676_v6, 16  ;;  %v1695_v28 = vld [vmem:[%s1669_s25 + $0x20] sm:$0xf] }
  0x20   : > { %1346 = vmatmul.mubr.msk.bf16.vlgmr.msra.gmra.mxu1 %vm559_vm0, %v1276_v13  ;;  %v433_v24 = vor.u32 %v432_v18, %v429_v17  ;;  %v464_v27 = vshll.u32 %v408_v16, 16  ;;  %v438_v30 = vrot.slane %v436_v19, 5  ;;  %v469_v33 = vshrl.u32 %v1681_v11, 16  ;;  %v412_v34 = vld [vmem:[%s1669_s25 + $0x24] sm:$0x1]  ;;  %s1034_s13 = scalar_lea.sflag [#allocation3], %s1774_s9 }
  0x21   : > { %v447_v31 = vor.u32 %v446_v21, %v443_v20  ;;  %v452_v32 = vrot.slane %v450_v22, 5  ;;  %1364 = vmatpush3.bf16.msra.mxu1 %v1442_v3  ;;  %v457_v36 = vrot.slane %v455_v25, 4  ;;  %v460_v37 = vrot.slane %v458_v26, 5  ;;  %v1709_v47 = vld [vmem:[%s1669_s25 + $0x28] sm:$0xf]  ;;  %s1448_s14 = scalar_lea.vmem %s1834_s17, 16 }
  0x22   : > { %v434_v35 = vrot.slane %v433_v24, 4  ;;  %v466_v38 = vrot.slane %v464_v27, 5  ;;  %v471_v40 = vrot.slane %v469_v33, 4  ;;  %v472_v41 = vshll.u32 %v1681_v11, 16  ;;  %v1714_v52 = vld [vmem:[%s1669_s25 + $0x30] sm:$0xf]  ;;  %p1449_p12 = scmp.ne.s32.totalorder %s1834_s17, %s1448_s14 }
  0x23   : > { %v448_v39 = vrot.slane %v447_v31, 4  ;;  %v478_v42 = vshll.u32 %v410_v23, 16  ;;  %v461_v44 = vor.u32 %v460_v37, %v457_v36  ;;  %v483_v45 = vshrl.u32 %v1695_v28, 16  ;;  %v1717_v57 = vld [vmem:[%s1669_s25 + $0x38] sm:$0xf] }
  0x24   : > { %v439_v43 = vsel %vm1697_vm3, %v434_v35, %v438_v30  ;;  %v486_v46 = vshll.u32 %v1695_v28, 16  ;;  %v474_v49 = vrot.slane %v472_v41, 5  ;;  %v492_v51 = vshll.u32 %v412_v34, 16  ;;  %v414_v3 = vld [vmem:[%s1669_s25 + $0x2c] sm:$0x1]  ;;  %p1450_p13 = pnand %p1449_p12, %p1629_p4 }
  0x25   : > { %v453_v48 = vsel %vm1697_vm3, %v448_v39, %v452_v32  ;;  %v480_v50 = vrot.slane %v478_v42, 5  ;;  %v462_v53 = vrot.slane %v461_v44, 4  ;;  %v485_v54 = vrot.slane %v483_v45, 4  ;;  %v416_v10 = vld [vmem:[%s1669_s25 + $0x34] sm:$0x1] }
  0x26   : > { %v488_v55 = vrot.slane %v486_v46, 5  ;;  %v1266_v56 = vcombine.low %v439_v43, %v453_v48  ;;  %v475_v58 = vor.u32 %v474_v49, %v471_v40  ;;  %v494_v59 = vrot.slane %v492_v51, 5  ;;  %v418_v19 = vld [vmem:[%s1669_s25 + $0x3c] sm:$0x1]  ;;  %v419_v24 = vld [vmem:[%s375_s8] sm:$0xf]  ;;  %p1451_p0 = pneg %p1450_p13 }
  0x27   : > { %v497_v60 = vshrl.u32 %v1709_v47, 16  ;;  %v500_v61 = vshll.u32 %v1709_v47, 16  ;;  %v467_v62 = vsel %vm1697_vm3, %v462_v53, %v466_v38  ;;  %v1277_v0 = vcombine.low %v1695_v28, %v1709_v47  ;;  %v420_v31 = vld [vmem:[%s375_s8 + $0x4] sm:$0x1]  ;;  %s1841_s8 = scalar_lea.hbm %s1916_s5, %s1306_s11 }
  0x28   : > { %v489_v63 = vor.u32 %v488_v55, %v485_v54  ;;  %1335 = vmatprep.mubr.msk.bf16.mxu0 %vm559_vm0, %v1266_v56  ;;  %v511_v1 = vshrl.u32 %v1714_v52, 16  ;;  %v476_v4 = vrot.slane %v475_v58, 4  ;;  %v1297_v7 = vcombine.low %v453_v48, %v467_v62 }
  0x29   : > { %v514_v8 = vshll.u32 %v1714_v52, 16  ;;  %v525_v9 = vshrl.u32 %v1717_v57, 16  ;;  %1349 = vmatprep.mubr.msk.bf16.mxu1 %vm559_vm0, %v1277_v0  ;;  %v528_v13 = vshll.u32 %v1717_v57, 16  ;;  %v1278_v14 = vcombine.low %v1714_v52, %v1717_v57 }
  0x2a   : > { %v490_v12 = vrot.slane %v489_v63, 4  ;;  %v499_v15 = vrot.slane %v497_v60, 4  ;;  %v481_v16 = vsel %vm1697_vm3, %v476_v4, %v480_v50  ;;  %v502_v17 = vrot.slane %v500_v61, 5 }
  0x2b   : > { %v506_v18 = vshll.u32 %v414_v3, 16  ;;  %v513_v20 = vrot.slane %v511_v1, 4  ;;  %v1267_v21 = vcombine.low %v467_v62, %v481_v16  ;;  %1350 = vmatmul.mubr.msk.bf16.gmra.mxu1 %vm559_vm0, %v1278_v14  ;;  %v516_v22 = vrot.slane %v514_v8, 5 }
  0x2c   : > { %v520_v23 = vshll.u32 %v416_v10, 16  ;;  %v495_v25 = vsel %vm1697_vm3, %v490_v12, %v494_v59  ;;  %v503_v26 = vor.u32 %v502_v17, %v499_v15  ;;  %v527_v30 = vrot.slane %v525_v9, 4  ;;  %1365 = vmatprep.mubr.msk.bf16.mxu1 %vm559_vm0, %v1297_v7 }
  0x2d   : > { %v508_v27 = vrot.slane %v506_v18, 5  ;;  %1336 = vmatmul.mubr.msk.bf16.vlgmr.msra.gmra.mxu0 %vm559_vm0, %v1267_v21  ;;  %v517_v32 = vor.u32 %v516_v22, %v513_v20  ;;  %v530_v34 = vrot.slane %v528_v13, 5  ;;  %v534_v35 = vshll.u32 %v418_v19, 16 }
  0x2e   : > { %v522_v33 = vrot.slane %v520_v23, 5  ;;  %v1298_v36 = vcombine.low %v481_v16, %v495_v25  ;;  %1354 = vmatpush3.bf16.msra.mxu0 %v1657_v2  ;;  %v504_v37 = vrot.slane %v503_v26, 4  ;;  %v841_v38 = vshrl.u32 %v419_v24, 16 }
  0x2f   : > { %v844_v39 = vshll.u32 %v419_v24, 16  ;;  %v518_v40 = vrot.slane %v517_v32, 4  ;;  %v531_v41 = vor.u32 %v530_v34, %v527_v30  ;;  %v536_v42 = vrot.slane %v534_v35, 5 }
  0x30   : > { %v850_v43 = vshll.u32 %v420_v31, 16  ;;  %v509_v44 = vsel %vm1697_vm3, %v504_v37, %v508_v27  ;;  %v843_v45 = vrot.slane %v841_v38, 4  ;;  %v1286_v55 = vcombine.low %v1673_v5, %v1676_v6 }
  0x31   : > { %v846_v46 = vrot.slane %v844_v39, 5  ;;  %v1268_v48 = vcombine.low %v495_v25, %v509_v44  ;;  %v523_v49 = vsel %vm1697_vm3, %v518_v40, %v522_v33  ;;  %v532_v50 = vrot.slane %v531_v41, 4 }
  0x32   : > { %v1299_v51 = vcombine.low %v509_v44, %v523_v49  ;;  %v852_v2 = vrot.slane %v850_v43, 5  ;;  %v1287_v61 = vcombine.low %v1681_v11, %v1695_v28  ;;  %v1288_v5 = vcombine.low %v1709_v47, %v1714_v52 }
  0x33   : > { %v847_v53 = vor.u32 %v846_v46, %v843_v45  ;;  %1339 = vmatprep.mubr.msk.bf16.mxu0 %vm559_vm0, %v1268_v48  ;;  %v537_v54 = vsel %vm1697_vm3, %v532_v50, %v536_v42  ;;  %1366 = vmatmul.mubr.msk.bf16.vlgmr.msra.gmra.mxu1 %vm559_vm0, %v1298_v36  ;;  %v1289_v6 = vcombine.low %v1717_v57, %v419_v24  ;;  %v1556_v11 = vmov 0.0  }
  0x34   : > { %v1269_v56 = vcombine.low %v523_v49, %v537_v54  ;;  %1369 = vmatprep.mubr.msk.bf16.mxu1 %vm559_vm0, %v1299_v51  ;;  %401 = vst.msk [vmem:[%s1777_s10] sm:$0x1] %vm400_vm4, %v1556_v11  ;;  %402 = vst.msk [vmem:[%s1782_s12] sm:$0x1] %vm400_vm4, %v1556_v11 }
  0x35   : > { %v848_v58 = vrot.slane %v847_v53, 4 }
  0x36   : > { %1340 = vmatmul.mubr.msk.bf16.gmra.mxu0 %vm559_vm0, %v1269_v56 }
  0x37   : > { %v853_v59 = vsel %vm1697_vm3, %v848_v58, %v852_v2  ;;  %1355 = vmatprep.mubr.msk.bf16.mxu0 %vm559_vm0, %v1286_v55 }
  0x38   : > { %v1300_v60 = vcombine.low %v537_v54, %v853_v59 }
  0x3b   : > { %1370 = vmatmul.mubr.msk.bf16.gmra.mxu1 %vm559_vm0, %v1300_v60 }
  0x3e   : > { %1356 = vmatmul.mubr.msk.bf16.vlgmr.msra.gmra.mxu0 %vm559_vm0, %v1287_v61 }
  0x3f   : > { %1359 = vmatprep.mubr.msk.bf16.mxu0 %vm559_vm0, %v1288_v5 }
  0x46   : > { %1360 = vmatmul.mubr.msk.bf16.gmra.mxu0 %vm559_vm0, %v1289_v6 }
  0xe0   : > { %v1347_v28 = vpop.f32.mrf.mxu1 }
  0xe2   : > { %v709_v29 = vpop.f32.mrf.mxu1 }
  0xe4   : > { %v1348_v47 = vpop.f32.mrf.mxu1 }
  0xe6   : > { %v712_v52 = vpop.f32.mrf.mxu1 }
  0xeb   : > { %v1351_v57 = vpop.f32.mrf.mxu1 }
  0xed   : > { %v1337_v62 = vpop.f32.mrf.mxu0  ;;  %v725_v63 = vpop.f32.mrf.mxu1 }
  0xee   : > { %v718_v16 = vadd.f32 %v1347_v28, %v1337_v62 }
  0xef   : > { %v606_v0 = vpop.f32.mrf.mxu0  ;;  %v1352_v1 = vpop.f32.mrf.mxu1 }
  0xf0   : > { %v710_v18 = vadd.f32 %v709_v29, %v606_v0 }
  0xf1   : > { %v1338_v3 = vpop.f32.mrf.mxu0  ;;  %v728_v4 = vpop.f32.mrf.mxu1 }
  0xf2   : > { %v721_v22 = vadd.f32 %v1348_v47, %v1338_v3 }
  0xf3   : > { %v609_v7 = vpop.f32.mrf.mxu0  ;;  %v1367_v8 = vpop.f32.mrf.mxu1 }
  0xf4   : > { %v713_v31 = vadd.f32 %v712_v52, %v609_v7 }
  0xf5   : > { %v914_v10 = vpop.f32.mrf.mxu1 }
  0xf6   : > { %v1341_v9 = vpop.f32.mrf.mxu0 }
  0xf7   : > { %v1368_v14 = vpop.f32.mrf.mxu1  ;;  %v734_v33 = vadd.f32 %v1351_v57, %v1341_v9 }
  0xf8   : > { %v622_v12 = vpop.f32.mrf.mxu0 }
  0xf9   : > { %v917_v20 = vpop.f32.mrf.mxu1  ;;  %v726_v37 = vadd.f32 %v725_v63, %v622_v12 }
  0xfa   : > { %v1342_v13 = vpop.f32.mrf.mxu0 }
  0xfb   : > { %v1371_v30 = vpop.f32.mrf.mxu1  ;;  %v737_v46 = vadd.f32 %v1352_v1, %v1342_v13 }
  0xfc   : > { %v625_v15 = vpop.f32.mrf.mxu0 }
  0xfd   : > { %v930_v38 = vpop.f32.mrf.mxu1  ;;  %v729_v53 = vadd.f32 %v728_v4, %v625_v15 }
  0xfe   : > { %v1357_v17 = vpop.f32.mrf.mxu0 }
  0xff   : > { %v834_v19 = vadd.f32 %v1357_v17, %v718_v16  ;;  %v1372_v55 = vpop.f32.mrf.mxu1 }
 0x100   : > { %v801_v21 = vpop.f32.mrf.mxu0 }
 0x101   : > { %v947_v23 = vadd.f32 %v1367_v8, %v834_v19  ;;  %v832_v24 = vadd.f32 %v801_v21, %v710_v18  ;;  %v933_v0 = vpop.f32.mrf.mxu1 }
 0x102   : > { %v1358_v25 = vpop.f32.mrf.mxu0 }
 0x103   : > { %956 = vst.msk [vmem:[%s1790_s16 + $0x10] sm:$0xff] %vm953_vm5, %v947_v23  ;;  %v945_v26 = vadd.f32 %v914_v10, %v832_v24  ;;  %v835_v27 = vadd.f32 %v1358_v25, %v721_v22  ;;  %v986_v43 = vmul.f32 %v947_v23, %v947_v23  ;;  %v965_v2 = vsel %vm953_vm5, %v947_v23, 0.0 }
 0x104   : > { %v804_v32 = vpop.f32.mrf.mxu0 }
 0x105   : > { %954 = vst.msk [vmem:[%s1790_s16] sm:$0xff] %vm953_vm5, %v945_v26  ;;  %v948_v34 = vadd.f32 %v1368_v14, %v835_v27  ;;  %v833_v35 = vadd.f32 %v804_v32, %v713_v31  ;;  %v984_v40 = vmul.f32 %v945_v26, %v945_v26  ;;  %v962_v48 = vsel %vm953_vm5, %v945_v26, 0.0 }
 0x106   : > { %v1361_v36 = vpop.f32.mrf.mxu0  ;;  %v995_v6 = vsel %vm953_vm5, %v986_v43, 0.0 }
 0x107   : > { %957 = vst.msk [vmem:[%s1790_s16 + $0x18] sm:$0xff] %vm953_vm5, %v948_v34  ;;  %v838_v39 = vadd.f32 %v1361_v36, %v734_v33  ;;  %v946_v41 = vadd.f32 %v917_v20, %v833_v35  ;;  %v992_v58 = vsel %vm953_vm5, %v984_v40, 0.0  ;;  %v987_v59 = vmul.f32 %v948_v34, %v948_v34 }
 0x108   : > { %v817_v42 = vpop.f32.mrf.mxu0  ;;  %v967_v29 = vsel %vm953_vm5, %v948_v34, 0.0 }
 0x109   : > { %v951_v44 = vadd.f32 %v1371_v30, %v838_v39  ;;  %v836_v45 = vadd.f32 %v817_v42, %v726_v37  ;;  %955 = vst.msk [vmem:[%s1790_s16 + $0x8] sm:$0xff] %vm953_vm5, %v946_v41  ;;  %v963_v49 = vsel %vm953_vm5, %v946_v41, 0.0  ;;  %v985_v50 = vmul.f32 %v946_v41, %v946_v41  ;;  %v1018_v41 = vld [vmem:[%s1782_s12] sm:$0x1] }
 0x10a   : > { %v1362_v51 = vpop.f32.mrf.mxu0  ;;  %v964_v54 = vadd.f32 %v963_v49, %v962_v48  ;;  %v997_v1 = vsel %vm953_vm5, %v987_v59, 0.0 }
 0x10b   : > { %960 = vst.msk [vmem:[%s1790_s16 + $0x30] sm:$0xff] %vm953_vm5, %v951_v44  ;;  %v949_v56 = vadd.f32 %v930_v38, %v836_v45  ;;  %v993_v60 = vsel %vm953_vm5, %v985_v50, 0.0  ;;  %v839_v61 = vadd.f32 %v1362_v51, %v737_v46  ;;  %v990_v9 = vmul.f32 %v951_v44, %v951_v44  ;;  %v1014_v38 = vld [vmem:[%s1777_s10] sm:$0x1] }
 0x10c   : > { %v820_v5 = vpop.f32.mrf.mxu0  ;;  %v966_v11 = vadd.f32 %v965_v2, %v964_v54  ;;  %v994_v28 = vadd.f32 %v993_v60, %v992_v58  ;;  %v973_v16 = vsel %vm953_vm5, %v951_v44, 0.0 }
 0x10d   : > { %958 = vst.msk [vmem:[%s1790_s16 + $0x20] sm:$0xff] %vm953_vm5, %v949_v56  ;;  %v988_v47 = vmul.f32 %v949_v56, %v949_v56  ;;  %v952_v52 = vadd.f32 %v1372_v55, %v839_v61  ;;  %v837_v57 = vadd.f32 %v820_v5, %v729_v53  ;;  %v969_v3 = vsel %vm953_vm5, %v949_v56, 0.0 }
 0x10e   : > { %v996_v62 = vadd.f32 %v995_v6, %v994_v28  ;;  %v968_v63 = vadd.f32 %v967_v29, %v966_v11  ;;  %v1003_v21 = vsel %vm953_vm5, %v990_v9, 0.0 }
 0x10f   : > { %961 = vst.msk [vmem:[%s1790_s16 + $0x38] sm:$0xff] %vm953_vm5, %v952_v52  ;;  %v950_v4 = vadd.f32 %v933_v0, %v837_v57  ;;  %v999_v10 = vsel %vm953_vm5, %v988_v47, 0.0  ;;  %v991_v17 = vmul.f32 %v952_v52, %v952_v52  ;;  %v975_v22 = vsel %vm953_vm5, %v952_v52, 0.0 }
 0x110   : > { %v970_v7 = vadd.f32 %v969_v3, %v968_v63  ;;  %v998_v8 = vadd.f32 %v997_v1, %v996_v62 }
 0x111   : > { %959 = vst.msk [vmem:[%s1790_s16 + $0x28] sm:$0xff] %vm953_vm5, %v950_v4  ;;  %v971_v12 = vsel %vm953_vm5, %v950_v4, 0.0  ;;  %v989_v13 = vmul.f32 %v950_v4, %v950_v4  ;;  %v1005_v25 = vsel %vm953_vm5, %v991_v17, 0.0  ;;  %s1452_s16 = sshll.u32 %s1557_s15, 4  ;;  %s1453_s16 = int_to_ptr.vmem [resolvable:$false] %s1452_s16 }
 0x112   : > { %v1000_v14 = vadd.f32 %v999_v10, %v998_v8  ;;  %v972_v15 = vadd.f32 %v971_v12, %v970_v7  ;;  %s1454_s25 = scalar_lea.vmem %s1453_s16, 32  ;;  %p1455_p1 = scmp.lt.s32.totalorder %s1834_s17, %s1453_s16 }
 0x113   : > { %v1001_v18 = vsel %vm953_vm5, %v989_v13, 0.0  ;;  %p1456_p2 = scmp.lt.s32.totalorder %s1454_s25, %s1448_s14 }
 0x114   : > { %v974_v19 = vadd.f32 %v973_v16, %v972_v15  ;;  %v1002_v20 = vadd.f32 %v1001_v18, %v1000_v14 }
 0x115   : > { %p1457_p3 = por %p1456_p2, %p1455_p1 }
 0x116   : > { %v976_v23 = vadd.f32 %v975_v22, %v974_v19  ;;  %v1004_v24 = vadd.f32 %v1003_v21, %v1002_v20 }
 0x117   : > { %p1458_p5 = pnand %p1457_p3, %p1451_p0 }
 0x118   : > { %v977_v26 = vrot.slane %v976_v23, 4  ;;  %v1006_v27 = vadd.f32 %v1005_v25, %v1004_v24 }
 0x11a   : > { %v978_v30 = vadd.f32 %v977_v26, %v976_v23  ;;  %v1007_v31 = vrot.slane %v1006_v27, 4 }
 0x11c   : > { %v979_v32 = vrot.slane %v978_v30, 2  ;;  %v1008_v33 = vadd.f32 %v1007_v31, %v1006_v27 }
 0x11e   : > { %v980_v34 = vadd.f32 %v979_v32, %v978_v30  ;;  %v1009_v35 = vrot.slane %v1008_v33, 2 }
 0x120   : > { %v981_v36 = vrot.slane %v980_v34, 1  ;;  %v1010_v37 = vadd.f32 %v1009_v35, %v1008_v33 }
 0x122   : > { %v982_v39 = vadd.f32 %v981_v36, %v980_v34  ;;  %v1011_v40 = vrot.slane %v1010_v37, 1 }
 0x124   : > { %v1015_v42 = vadd.f32 %v1014_v38, %v982_v39  ;;  %v1012_v43 = vadd.f32 %v1011_v40, %v1010_v37 }
 0x126   : > { %1017 = vst.msk [vmem:[%s1777_s10] sm:$0x1] %vm400_vm4, %v1015_v42  ;;  %v1019_v44 = vadd.f32 %v1018_v41, %v1012_v43 }
 0x127   : > { %1461 = shalt.err (!%p1458_p5)
}
 0x128   : > { %s1462_s10 = scalar_lea.hbm %s1832_s29, 16  ;;  %s1466_s21 = scalar_lea.hbm %s1915_s4, 32 }
 0x129   : > { %p1463_p6 = scmp.ne.s32.totalorder %s1832_s29, %s1462_s10  ;;  %p1467_p10 = scmp.lt.s32.totalorder %s1832_s29, %s1915_s4 }
 0x12a   : > { %p1468_p11 = scmp.lt.s32.totalorder %s1466_s21, %s1462_s10 }
 0x12b   : > { %p1464_p7 = pnand %p1463_p6, %p1629_p4 }
 0x12c   : > { %p1469_p12 = por %p1468_p11, %p1467_p10 }
 0x12d   : > { %p1465_p9 = pneg %p1464_p7 }
 0x12f   : > { %p1470_p13 = pnand %p1469_p12, %p1465_p9 }
 0x131   : > { %1473 = shalt.err (!%p1470_p13)
}
 0x132   : > { %1375 = dma.vmem_to_hbm [thread:$0]  (%p1629_p4), %s1834_s17, 16, %s1832_s29, %s1034_s13   ;;  %1020 = vst.msk [vmem:[%s1782_s12] sm:$0x1] %vm400_vm4, %v1019_v44 }
 0x133   : > { %s1038_s14 = scalar_lea.sflag [#allocation5], %s1774_s9  ;;  %s1474_s16 = scalar_lea.vmem %s1843_s24, 16 }
 0x134   : > { %p1475_p0 = scmp.ne.s32.totalorder %s1843_s24, %s1474_s16  ;;  %s1558_s25 = smov [#allocation4]  }
 0x135   : > { %s1478_s10 = sshll.u32 %s1558_s25, 4  ;;  %s1479_s10 = int_to_ptr.vmem [resolvable:$false] %s1478_s10 }
 0x136   : > { %p1476_p1 = pnand %p1475_p0, %p1629_p4  ;;  %s1480_s11 = scalar_lea.vmem %s1479_s10, 32 }
 0x137   : > { %p1481_p3 = scmp.lt.s32.totalorder %s1843_s24, %s1479_s10  ;;  %p1482_p5 = scmp.lt.s32.totalorder %s1480_s11, %s1474_s16 }
 0x138   : > { %p1477_p2 = pneg %p1476_p1 }
 0x139   : > { %p1483_p6 = por %p1482_p5, %p1481_p3 }
 0x13b   : > { %p1484_p7 = pnand %p1483_p6, %p1477_p2 }
 0x13d   : > { %1487 = shalt.err (!%p1484_p7)
}
 0x13e   : > { %s1488_s12 = scalar_lea.hbm %s1841_s8, 16  ;;  %s1492_s29 = scalar_lea.hbm %s1916_s5, 32 }
 0x13f   : > { %p1489_p9 = scmp.ne.s32.totalorder %s1841_s8, %s1488_s12  ;;  %p1493_p12 = scmp.lt.s32.totalorder %s1841_s8, %s1916_s5 }
 0x140   : > { %p1494_p13 = scmp.lt.s32.totalorder %s1492_s29, %s1488_s12 }
 0x141   : > { %p1490_p10 = pnand %p1489_p9, %p1629_p4 }
 0x142   : > { %p1495_p0 = por %p1494_p13, %p1493_p12 }
 0x143   : > { %p1491_p11 = pneg %p1490_p10 }
 0x145   : > { %p1496_p1 = pnand %p1495_p0, %p1491_p11 }
 0x147   : > { %1499 = shalt.err (!%p1496_p1)
}
 0x148   : > { %1376 = dma.vmem_to_hbm [thread:$0]  (%p1629_p4), %s1843_s24, 16, %s1841_s8, %s1038_s14  }
 0x149 PF: > { %p1387_p2 = scmp.ge.s32.totalorder %s1554_s23, 2  ;;  %s1096_s21 = sand.u32 1, %s1534_s18  }
 0x14a   : > { %s1097_s7 = scalar_lea.sflag [#allocation3], %s1096_s21 }
 0x14b   : > { %p1380_p3 = pnand %p1387_p2, %p1636_p8 }
 0x14d   : > { %p1381_p5 = pneg %p1380_p3 }
 0x14f   : > { %1525 = dma.done.wait (%p1381_p5), %s1097_s7, 16  }
 0x150   : > { %1527 = vsyncadd (%p1381_p5), %s1097_s7, 4294967280  ;;  %s1105_s15 = scalar_lea.sflag [#allocation5], %s1096_s21 }
 0x151   : > { %1529 = dma.done.wait (%p1381_p5), %s1105_s15, 16  }
 0x152   : > { %1531 = vsyncadd (%p1381_p5), %s1105_s15, 4294967280  ;;  %s22_s23 = sadd.s32 1, %s1554_s23   ;;  %s1921_s18 = smov %s1538_s19 }
 0x153   : > { %p19_p6 = scmp.ge.s32.totalorder %s22_s23, 4   ;;  %s1922_s19 = smov %s1542_s20 }
 0x154   : > { %s1923_s20 = smov %s1642_s6  ;;  %s1924_s21 = smov %s1550_s22 }
 0x155   : > { %s1925_s22 = smov %s1927_s26  ;;  %21 = sbr.rel (!%p19_p6) target bundleno = 6 (0x6), region = 109 }
 0x15a   :  { %1109 = vsyncpa [#allocation3], 1 }
 0x15b   :  { %1111 = vsyncpa [#allocation3 + $0x1], 1 }
 0x15c   :  { %1112 = vsyncpa [#allocation5], 1 }
 0x15d   :  { %1114 = vsyncpa [#allocation5 + $0x1], 1 }

</bundles_post_ra>
